<compile_context>
chip_gen: v7x
topology: tpu7x:2x2x1
jax: 0.10.0
libtpu: 0.0.40
codegen_flags: <defaults>
</compile_context>

<pallas_src>
import functools

import jax
import jax.numpy as jnp
from jax.experimental import pallas as pl
from jax.experimental.pallas import tpu as pltpu

INPUT_SIZE = 5
OUTPUT_SIZE = 2

_LANE = 128
_SUBLANE = 8
_SMALL_BATCH_MAX = 1024  # <= this: single whole-array VMEM invocation (tiny footprint)


def _round_up(n, m):
    return ((n + m - 1) // m) * m


def _linear_kernel_small(xT_ref, w_ref, b_ref, oT_ref):
    # xT_ref: VMEM (IN, B)   -- batch on lanes
    # w_ref : SMEM (OUT, IN) -- PyTorch layout, scalar reads, no transpose
    # b_ref : SMEM (OUT,)
    # oT_ref: VMEM (OUT, B)
    for o in range(OUTPUT_SIZE):
        acc = xT_ref[0:1, :] * w_ref[o, 0] + b_ref[o]          # bias folded into init
        for k in range(1, INPUT_SIZE):
            acc = acc + xT_ref[k:k + 1, :] * w_ref[o, k]        # VPU scalar-bcast MAC
        oT_ref[o:o + 1, :] = acc.astype(oT_ref.dtype)


def _linear_kernel_tiled(xT_ref, w_ref, b_ref, oT_ref):
    # xT_ref: VMEM (IN, block_rows, 128)  -- dense full-vreg slabs (8/8 sublanes)
    # w_ref : SMEM (OUT, IN)
    # b_ref : SMEM (OUT,)
    # oT_ref: VMEM (OUT, block_rows, 128) -- dense, unmasked vst
    for o in range(OUTPUT_SIZE):
        acc = xT_ref[0] * w_ref[o, 0] + b_ref[o]                # bias folded into init
        for k in range(1, INPUT_SIZE):
            acc = acc + xT_ref[k] * w_ref[o, k]                 # VPU scalar-bcast MAC
        oT_ref[o] = acc.astype(oT_ref.dtype)


def net_forward_t(xT, weight, bias, *, max_block_rows=1024):
    """Preferred transposed-contract linear: xT (IN, B) -> yT (OUT, B).

    No boundary transposes; callers that keep activations in (features, batch)
    layout pay only the kernel's ~28 B/sample of HBM traffic.
    """
    in_dim, batch = xT.shape
    assert in_dim == INPUT_SIZE
    smem = pltpu.MemorySpace.SMEM
    vmem = pltpu.MemorySpace.VMEM

    if batch <= _SMALL_BATCH_MAX:
        # Small batch: single invocation, whole-array blocks, no grid machinery.
        return pl.pallas_call(
            _linear_kernel_small,
            out_shape=jax.ShapeDtypeStruct((OUTPUT_SIZE, batch), xT.dtype),
            in_specs=[
                pl.BlockSpec(memory_space=vmem),
                pl.BlockSpec(memory_space=smem),
                pl.BlockSpec(memory_space=smem),
            ],
            out_specs=pl.BlockSpec(memory_space=vmem),
        )(xT, weight, bias)

    # ---- large batch: dense 3-D tiling over the (sublane, lane) batch axes ----
    rows = pl.cdiv(batch, _LANE)
    block_rows = min(max_block_rows, _round_up(rows, _SUBLANE))   # multiple of 8
    rows_pad = _round_up(rows, block_rows)                        # grid divides evenly
    batch_pad = rows_pad * _LANE
    if batch_pad != batch:
        xT = jnp.pad(xT, ((0, 0), (0, batch_pad - batch)))
    xT3 = xT.reshape(INPUT_SIZE, rows_pad, _LANE)                 # free: contiguous last dim

    itemsize = jnp.dtype(xT.dtype).itemsize
    cost = pl.CostEstimate(
        flops=2 * INPUT_SIZE * OUTPUT_SIZE * batch_pad,
        transcendentals=0,
        bytes_accessed=(INPUT_SIZE + OUTPUT_SIZE) * batch_pad * itemsize
        + (INPUT_SIZE + 1) * OUTPUT_SIZE * itemsize,
    )

    yT3 = pl.pallas_call(
        _linear_kernel_tiled,
        out_shape=jax.ShapeDtypeStruct((OUTPUT_SIZE, rows_pad, _LANE), xT.dtype),
        grid=(rows_pad // block_rows,),
        in_specs=[
            pl.BlockSpec((INPUT_SIZE, block_rows, _LANE), lambda i: (0, i, 0)),
            pl.BlockSpec(memory_space=smem),   # weight pinned in SMEM across the grid
            pl.BlockSpec(memory_space=smem),   # bias pinned in SMEM across the grid
        ],
        out_specs=pl.BlockSpec((OUTPUT_SIZE, block_rows, _LANE), lambda i: (0, i, 0)),
        compiler_params=pltpu.CompilerParams(
            # Note: pltpu.CORE_PARALLEL would shard tiles across v7x's 2 TCs;
            # kept as plain "parallel" to stay safe on single-TC v5e/v6e.
            dimension_semantics=("parallel",),
        ),
        cost_estimate=cost,
    )(xT3, weight, bias)

    yT = yT3.reshape(OUTPUT_SIZE, batch_pad)
    if batch_pad != batch:
        yT = yT[:, :batch]
    return yT


@functools.partial(jax.jit, static_argnames=("max_block_rows",))
def net_forward(x, weight, bias, *, max_block_rows=1024):
    """PyTorch-contract forward: x (B, 5) -> (B, 2), y = x @ W^T + b.

    Prefer `net_forward_t` when the surrounding graph can keep activations in
    (features, batch) layout: the boundary transposes here are HBM copies that
    cannot fuse into the pallas custom call.
    """
    out = net_forward_t(x.T, weight, bias, max_block_rows=max_block_rows).T
    # Mirror the module's print of input/output sizes (trace-time only under jit).
    print("\tIn Model: input size", tuple(x.shape), "output size", tuple(out.shape))
    return out


if __name__ == "__main__":
    key = jax.random.PRNGKey(0)
    kx, kw, kb, kx2 = jax.random.split(key, 4)

    # Deterministic parameter init mimicking nn.Linear's U(-1/sqrt(fan_in), +).
    bound = 1.0 / jnp.sqrt(jnp.float32(INPUT_SIZE))
    weight = jax.random.uniform(
        kw, (OUTPUT_SIZE, INPUT_SIZE), jnp.float32, -bound, bound
    )
    bias = jax.random.uniform(kb, (OUTPUT_SIZE,), jnp.float32, -bound, bound)

    # Small-batch path (whole-array VMEM blocks, no grid).
    x = jax.random.normal(kx, (8, INPUT_SIZE), dtype=jnp.float32)
    y = jax.block_until_ready(net_forward(x, weight, bias))
    y_ref = x @ weight.T + bias
    assert jnp.allclose(y, y_ref, atol=1e-5, rtol=1e-5), "small-batch mismatch"

    # Tiled path (dense 3-D slabs + grid + lane padding), kept small for the test
    # by shrinking the tile: batch=2050 is not a multiple of 128 and spans
    # multiple (8, 128) row tiles, exercising padding and the grid.
    x2 = jax.random.normal(kx2, (2050, INPUT_SIZE), dtype=jnp.float32)
    y2 = jax.block_until_ready(net_forward(x2, weight, bias, max_block_rows=8))
    y2_ref = x2 @ weight.T + bias
    assert jnp.allclose(y2, y2_ref, atol=1e-5, rtol=1e-5), "tiled-batch mismatch"

    print("KERNEL_OK")
</pallas_src>

<mosaic_0001>
module attributes {stable_mosaic.version = 11 : i64} {
  func.func @_linear_kernel_small(%arg0: memref<5x8xf32, #tpu.memory_space<vmem>>, %arg1: memref<2x5xf32, #tpu.memory_space<smem>>, %arg2: memref<2xf32, #tpu.memory_space<smem>>, %arg3: memref<2x8xf32, #tpu.memory_space<vmem>>) attributes {dimension_semantics = [], scalar_prefetch = 0 : i64, scratch_operands = 0 : i64, tpu.core_type = #tpu.core_type<tc>} {
    %c0 = arith.constant 0 : index
    %c0_0 = arith.constant 0 : index
    %0 = vector.load %arg0[%c0, %c0_0] : memref<5x8xf32, #tpu.memory_space<vmem>>, vector<1x8xf32>
    %c0_1 = arith.constant 0 : index
    %c0_2 = arith.constant 0 : index
    %1 = memref.load %arg1[%c0_1, %c0_2] : memref<2x5xf32, #tpu.memory_space<smem>>
    %2 = vector.broadcast %1 : f32 to vector<1x8xf32>
    %3 = arith.mulf %0, %2 : vector<1x8xf32>
    %c0_3 = arith.constant 0 : index
    %4 = memref.load %arg2[%c0_3] : memref<2xf32, #tpu.memory_space<smem>>
    %5 = vector.broadcast %4 : f32 to vector<1x8xf32>
    %6 = arith.addf %3, %5 : vector<1x8xf32>
    %c1 = arith.constant 1 : index
    %c0_4 = arith.constant 0 : index
    %7 = vector.load %arg0[%c1, %c0_4] : memref<5x8xf32, #tpu.memory_space<vmem>>, vector<1x8xf32>
    %c0_5 = arith.constant 0 : index
    %c1_6 = arith.constant 1 : index
    %8 = memref.load %arg1[%c0_5, %c1_6] : memref<2x5xf32, #tpu.memory_space<smem>>
    %9 = vector.broadcast %8 : f32 to vector<1x8xf32>
    %10 = arith.mulf %7, %9 : vector<1x8xf32>
    %11 = arith.addf %6, %10 : vector<1x8xf32>
    %c2 = arith.constant 2 : index
    %c0_7 = arith.constant 0 : index
    %12 = vector.load %arg0[%c2, %c0_7] : memref<5x8xf32, #tpu.memory_space<vmem>>, vector<1x8xf32>
    %c0_8 = arith.constant 0 : index
    %c2_9 = arith.constant 2 : index
    %13 = memref.load %arg1[%c0_8, %c2_9] : memref<2x5xf32, #tpu.memory_space<smem>>
    %14 = vector.broadcast %13 : f32 to vector<1x8xf32>
    %15 = arith.mulf %12, %14 : vector<1x8xf32>
    %16 = arith.addf %11, %15 : vector<1x8xf32>
    %c3 = arith.constant 3 : index
    %c0_10 = arith.constant 0 : index
    %17 = vector.load %arg0[%c3, %c0_10] : memref<5x8xf32, #tpu.memory_space<vmem>>, vector<1x8xf32>
    %c0_11 = arith.constant 0 : index
    %c3_12 = arith.constant 3 : index
    %18 = memref.load %arg1[%c0_11, %c3_12] : memref<2x5xf32, #tpu.memory_space<smem>>
    %19 = vector.broadcast %18 : f32 to vector<1x8xf32>
    %20 = arith.mulf %17, %19 : vector<1x8xf32>
    %21 = arith.addf %16, %20 : vector<1x8xf32>
    %c4 = arith.constant 4 : index
    %c0_13 = arith.constant 0 : index
    %22 = vector.load %arg0[%c4, %c0_13] : memref<5x8xf32, #tpu.memory_space<vmem>>, vector<1x8xf32>
    %c0_14 = arith.constant 0 : index
    %c4_15 = arith.constant 4 : index
    %23 = memref.load %arg1[%c0_14, %c4_15] : memref<2x5xf32, #tpu.memory_space<smem>>
    %24 = vector.broadcast %23 : f32 to vector<1x8xf32>
    %25 = arith.mulf %22, %24 : vector<1x8xf32>
    %26 = arith.addf %21, %25 : vector<1x8xf32>
    %c0_16 = arith.constant 0 : index
    %c0_17 = arith.constant 0 : index
    %27 = vector.load %arg3[%c0_16, %c0_17] : memref<2x8xf32, #tpu.memory_space<vmem>>, vector<1x8xf32>
    tpu.vector_store %arg3[%c0_16, %c0_17], %26 {strides = array<i32>} : memref<2x8xf32, #tpu.memory_space<vmem>>, vector<1x8xf32>,
    %c0_18 = arith.constant 0 : index
    %c0_19 = arith.constant 0 : index
    %28 = vector.load %arg0[%c0_18, %c0_19] : memref<5x8xf32, #tpu.memory_space<vmem>>, vector<1x8xf32>
    %c1_20 = arith.constant 1 : index
    %c0_21 = arith.constant 0 : index
    %29 = memref.load %arg1[%c1_20, %c0_21] : memref<2x5xf32, #tpu.memory_space<smem>>
    %30 = vector.broadcast %29 : f32 to vector<1x8xf32>
    %31 = arith.mulf %28, %30 : vector<1x8xf32>
    %c1_22 = arith.constant 1 : index
    %32 = memref.load %arg2[%c1_22] : memref<2xf32, #tpu.memory_space<smem>>
    %33 = vector.broadcast %32 : f32 to vector<1x8xf32>
    %34 = arith.addf %31, %33 : vector<1x8xf32>
    %c1_23 = arith.constant 1 : index
    %c0_24 = arith.constant 0 : index
    %35 = vector.load %arg0[%c1_23, %c0_24] : memref<5x8xf32, #tpu.memory_space<vmem>>, vector<1x8xf32>
    %c1_25 = arith.constant 1 : index
    %c1_26 = arith.constant 1 : index
    %36 = memref.load %arg1[%c1_25, %c1_26] : memref<2x5xf32, #tpu.memory_space<smem>>
    %37 = vector.broadcast %36 : f32 to vector<1x8xf32>
    %38 = arith.mulf %35, %37 : vector<1x8xf32>
    %39 = arith.addf %34, %38 : vector<1x8xf32>
    %c2_27 = arith.constant 2 : index
    %c0_28 = arith.constant 0 : index
    %40 = vector.load %arg0[%c2_27, %c0_28] : memref<5x8xf32, #tpu.memory_space<vmem>>, vector<1x8xf32>
    %c1_29 = arith.constant 1 : index
    %c2_30 = arith.constant 2 : index
    %41 = memref.load %arg1[%c1_29, %c2_30] : memref<2x5xf32, #tpu.memory_space<smem>>
    %42 = vector.broadcast %41 : f32 to vector<1x8xf32>
    %43 = arith.mulf %40, %42 : vector<1x8xf32>
    %44 = arith.addf %39, %43 : vector<1x8xf32>
    %c3_31 = arith.constant 3 : index
    %c0_32 = arith.constant 0 : index
    %45 = vector.load %arg0[%c3_31, %c0_32] : memref<5x8xf32, #tpu.memory_space<vmem>>, vector<1x8xf32>
    %c1_33 = arith.constant 1 : index
    %c3_34 = arith.constant 3 : index
    %46 = memref.load %arg1[%c1_33, %c3_34] : memref<2x5xf32, #tpu.memory_space<smem>>
    %47 = vector.broadcast %46 : f32 to vector<1x8xf32>
    %48 = arith.mulf %45, %47 : vector<1x8xf32>
    %49 = arith.addf %44, %48 : vector<1x8xf32>
    %c4_35 = arith.constant 4 : index
    %c0_36 = arith.constant 0 : index
    %50 = vector.load %arg0[%c4_35, %c0_36] : memref<5x8xf32, #tpu.memory_space<vmem>>, vector<1x8xf32>
    %c1_37 = arith.constant 1 : index
    %c4_38 = arith.constant 4 : index
    %51 = memref.load %arg1[%c1_37, %c4_38] : memref<2x5xf32, #tpu.memory_space<smem>>
    %52 = vector.broadcast %51 : f32 to vector<1x8xf32>
    %53 = arith.mulf %50, %52 : vector<1x8xf32>
    %54 = arith.addf %49, %53 : vector<1x8xf32>
    %c1_39 = arith.constant 1 : index
    %c0_40 = arith.constant 0 : index
    %55 = vector.load %arg3[%c1_39, %c0_40] : memref<2x8xf32, #tpu.memory_space<vmem>>, vector<1x8xf32>
    tpu.vector_store %arg3[%c1_39, %c0_40], %54 {strides = array<i32>} : memref<2x8xf32, #tpu.memory_space<vmem>>, vector<1x8xf32>,
    return
  }
}

</mosaic_0001>

<bundles_post_ra>
// kernel: net_forward.1
= control target key start
LH: loop header
LB: loop body
LE: loop exit
PB: predicated region body
PF: predicated region fallthrough
CT: control target
= control target key end

     0   :  { %8 = vsyncpa [#allocation4], 0  ;;  %s261_s0 = inlined_call_operand.vmem [shape: f32[5,8], index: 0, kind: input, shape index: {}]   ;;  %s262_s1 = inlined_call_operand.vmem [shape: f32[2,5], index: 1, kind: input, shape index: {}]   ;;  %s263_s2 = inlined_call_operand.vmem [shape: f32[2], index: 2, kind: input, shape index: {}]   ;;  %s264_s3 = inlined_call_operand.hbm [shape: f32[2,8], index: 3, kind: output, shape index: {}]  }
   0x1   :  { %9 = vsyncpa [#allocation6], 0 }
   0x2   :  { %10 = vsyncpa [#allocation3], 0  ;;  %s19_s14 = sshll.u32 %s262_s1, 4  ;;  %s29_s17 = sshll.u32 %s263_s2, 4  ;;  %s20_s14 = int_to_ptr.vmem [resolvable:$true] %s19_s14  ;;  %s30_s17 = int_to_ptr.vmem [resolvable:$true] %s29_s17 }
   0x3   :  { %s126_s18 = scalar_lea.vmem %s20_s14, 32  ;;  %p131_p1 = scmp.lt.s32.totalorder %s20_s14, %s20_s14 }
   0x4   :  { %p127_p0 = scmp.ne.s32.totalorder %s20_s14, %s126_s18  ;;  %p132_p2 = scmp.lt.s32.totalorder %s126_s18, %s126_s18 }
   0x6   :  { %p133_p3 = por %p132_p2, %p131_p1 }
   0x8   :  { %p134_p4 = pnand %p133_p3, %p127_p0 }
   0xa   :  { %137 = shalt.err (!%p134_p4)
}
   0xb   :  { %s178_s19 = smov [#allocation2]   ;;  %s138_s20 = scalar_lea.vmem %s30_s17, 16 }
   0xc   :  { %22 = dma.vmem_to_smem %s20_s14, 32, %s178_s19, [#allocation4]  }
   0xd   :  { %p139_p5 = scmp.ne.s32.totalorder %s30_s17, %s138_s20  ;;  %p143_p6 = scmp.lt.s32.totalorder %s30_s17, %s30_s17 }
   0xe   :  { %p144_p7 = scmp.lt.s32.totalorder %s138_s20, %s138_s20 }
  0x10   :  { %p145_p8 = por %p144_p7, %p143_p6 }
  0x12   :  { %p146_p9 = pnand %p145_p8, %p139_p5 }
  0x14   :  { %149 = shalt.err (!%p146_p9)
}
  0x15   :  { %s179_s1 = smov [#allocation5]  }
  0x16   :  { %32 = dma.vmem_to_smem %s30_s17, 16, %s179_s1, [#allocation6]  }
  0x17   :  { %172 = dma.done.wait [#allocation4], 32  }
  0x18   :  { %173 = vsyncadd [#allocation4], 4294967264 }
  0x19   :  { %174 = dma.done.wait [#allocation6], 16  }
  0x1a   :  { %175 = vsyncadd [#allocation6], 4294967280 }
  0x1b   :  { %39 = sfence }
  0x1c   :  { %s41_s2 = sld [smem:[#allocation2]]  ;;  %s113_s22 = sld [smem:[#allocation2 + $0x1]]  ;;  %v40_v0 = vld [vmem:[%s261_s0] sm:$0x1]  ;;  %v47_v1 = vld [vmem:[%s261_s0 + $0x1] sm:$0x1] }
  0x1d   :  { %s44_s21 = sld [smem:[#allocation5]]  ;;  %s114_s23 = sld [smem:[#allocation2 + $0x2]]  ;;  %v52_v4 = vld [vmem:[%s261_s0 + $0x2] sm:$0x1]  ;;  %v57_v9 = vld [vmem:[%s261_s0 + $0x3] sm:$0x1] }
  0x1e   :  { %s115_s24 = sld [smem:[#allocation2 + $0x3]]  ;;  %s207_s25 = sld [smem:[#allocation2 + $0x4]]  ;;  %v69_v11 = vld [vmem:[%s261_s0] sm:$0x1]  ;;  %v62_v14 = vld [vmem:[%s261_s0 + $0x4] sm:$0x1] }
  0x1f   :  { %s117_s28 = sld [smem:[#allocation2 + $0x80]]  ;;  %s212_s29 = sld [smem:[#allocation5 + $0x1]]  ;;  %v76_v15 = vld [vmem:[%s261_s0 + $0x1] sm:$0x1]  ;;  %v81_v19 = vld [vmem:[%s261_s0 + $0x2] sm:$0x1] }
  0x20   :  { %s119_s5 = sld [smem:[#allocation2 + $0x81]]  ;;  %s120_s8 = sld [smem:[#allocation2 + $0x82]]  ;;  %v86_v26 = vld [vmem:[%s261_s0 + $0x3] sm:$0x1]  ;;  %v91_v32 = vld [vmem:[%s261_s0 + $0x4] sm:$0x1] }
  0x21   :  { %s220_s9 = sld [smem:[#allocation2 + $0x83]]  ;;  %s222_s10 = sld [smem:[#allocation2 + $0x84]]  ;;  %vm67_vm0 = vcmask 57344  }
  0x22   :  { %v42_v2 = vstv %s41_s2  ;;  %v49_v6 = vstv %s113_s22 }
  0x23   :  { %v45_v3 = vstv %s44_s21  ;;  %v43_v5 = vmul.f32 %v42_v2, %v40_v0  ;;  %v50_v7 = vmul.f32 %v49_v6, %v47_v1  ;;  %v54_v8 = vstv %s114_s23  ;;  %s180_s23 = smov [#allocation7]  }
  0x24   :  { %v59_v10 = vstv %s115_s24  ;;  %v55_v13 = vmul.f32 %v54_v8, %v52_v4  ;;  %v64_v16 = vstv %s207_s25  ;;  %s103_s24 = sshll.u32 %s180_s23, 4  ;;  %s104_s24 = int_to_ptr.vmem [resolvable:$true] %s103_s24 }
  0x25   :  { %v46_v12 = vadd.f32 %v45_v3, %v43_v5  ;;  %v71_v17 = vstv %s117_s28  ;;  %v74_v18 = vstv %s212_s29  ;;  %v60_v21 = vmul.f32 %v59_v10, %v57_v9  ;;  %s150_s25 = scalar_lea.vmem %s104_s24, 32  ;;  %p155_p11 = scmp.lt.s32.totalorder %s104_s24, %s104_s24 }
  0x26   :  { %v72_v22 = vmul.f32 %v71_v17, %v69_v11  ;;  %v78_v23 = vstv %s119_s5  ;;  %v83_v25 = vstv %s120_s8  ;;  %v65_v29 = vmul.f32 %v64_v16, %v62_v14  ;;  %p151_p10 = scmp.ne.s32.totalorder %s104_s24, %s150_s25  ;;  %p156_p12 = scmp.lt.s32.totalorder %s150_s25, %s150_s25 }
  0x27   :  { %v51_v20 = vadd.f32 %v50_v7, %v46_v12  ;;  %v79_v24 = vmul.f32 %v78_v23, %v76_v15  ;;  %v88_v27 = vstv %s220_s9  ;;  %v84_v31 = vmul.f32 %v83_v25, %v81_v19 }
  0x28   :  { %v75_v30 = vadd.f32 %v74_v18, %v72_v22  ;;  %v93_v33 = vstv %s222_s10  ;;  %v89_v36 = vmul.f32 %v88_v27, %v86_v26  ;;  %p157_p13 = por %p156_p12, %p155_p11 }
  0x29   :  { %v56_v28 = vadd.f32 %v55_v13, %v51_v20  ;;  %v94_v39 = vmul.f32 %v93_v33, %v91_v32 }
  0x2a   :  { %v80_v35 = vadd.f32 %v79_v24, %v75_v30  ;;  %p158_p0 = pnand %p157_p13, %p151_p10 }
  0x2b   :  { %v61_v34 = vadd.f32 %v60_v21, %v56_v28 }
  0x2c   :  { %v85_v38 = vadd.f32 %v84_v31, %v80_v35 }
  0x2d   :  { %v66_v37 = vadd.f32 %v65_v29, %v61_v34 }
  0x2e   :  { %v90_v40 = vadd.f32 %v89_v36, %v85_v38 }
  0x2f   :  { %68 = vst.msk [vmem:[#allocation7] sm:$0x1] %vm67_vm0, %v66_v37 }
  0x30   :  { %v95_v41 = vadd.f32 %v94_v39, %v90_v40 }
  0x32   :  { %96 = vst.msk [vmem:[#allocation7 + $0x1] sm:$0x1] %vm67_vm0, %v95_v41 }
  0x33   :  { %161 = shalt.err (!%p158_p0)
}
  0x34   :  { %s162_s27 = scalar_lea.hbm %s264_s3, 32 }
  0x35   :  { %p163_p1 = scmp.ne.s32.totalorder %s264_s3, %s162_s27  ;;  %p166_p2 = scmp.lt.u32.totalorder %s162_s27, %s264_s3 }
  0x37   :  { %p168_p3 = pnand %p166_p2, %p163_p1 }
  0x39   :  { %171 = shalt.err (!%p168_p3)
}
  0x3a   :  { %106 = dma.vmem_to_hbm [thread:$0]  %s104_s24, 32, %s264_s3, [#allocation3]  }
  0x3b   :  { %176 = dma.done.wait [#allocation3], 32  }
  0x3c   :  { %177 = vsyncadd [#allocation3], 4294967264 }
  0x3d   :  { %110 = vsyncpa [#allocation3], 1 }
  0x3e   :  { %111 = vsyncpa [#allocation4], 1 }
  0x3f   :  { %112 = vsyncpa [#allocation6], 1 }

</bundles_post_ra>
